<compile_context>
chip_gen: v5e
topology: v5e:2x2
jax: 0.10.0
libtpu: 0.0.40
codegen_flags: <defaults>
</compile_context>

<pallas_src>
from math import sqrt

import jax
import jax.numpy as jnp
from jax.experimental import pallas as pl
from jax.experimental.pallas import tpu as pltpu


def _linear_on_channel_kernel(x_ref, wb_ref, o_ref):
    # x_ref : [TB, C_in, TS]   TB batch elements, one lane-dense spatial tile
    # wb_ref: [C_out, C_in+1]  weight with bias packed as the last column
    # o_ref : [TB, C_out, TS]
    tb = x_ref.shape[0]
    c_in = x_ref.shape[1]
    wb = wb_ref[...]
    w = wb[:, :c_in].astype(x_ref.dtype)   # [C_out, C_in]
    b = wb[:, c_in:]                       # [C_out, 1] -> broadcasts over lanes
    # Static unrolled loop: TB independent 2-D MXU matmuls, no transposes.
    for i in range(tb):
        y = jnp.dot(w, x_ref[i], preferred_element_type=jnp.float32) + b
        o_ref[i] = y.astype(o_ref.dtype)


def _pick_tiles(B, C_in, C_out, HW, bytes_per_elt=4):
    """Choose (batch_tile, spatial_tile) that stay well inside scoped VMEM."""
    # --- spatial tile: largest lane-dense (multiple-of-128) divisor of HW ---
    if HW % 128 == 0:
        ts = HW
        # Keep (C_in + C_out) * ts * 2 buffers under ~8 MiB per batch element.
        max_lane = max(128, (8 << 20) // (2 * (C_in + C_out) * bytes_per_elt))
        while ts > max_lane and ts % 2 == 0 and (ts // 2) % 128 == 0:
            ts //= 2
    else:
        ts = HW  # full-extent block is always legal (masked stores; rare case)
        # TODO(synk): pad HW to a multiple of 128 in the wrapper if this path
        # ever becomes hot, to recover unmasked lane-dense stores.

    # --- batch tile: fold several batch rows into one grid step ---------------
    per_batch_bytes = (C_in + C_out) * ts * bytes_per_elt
    budget = 4 << 20          # per-buffer budget; x2 double buffering is safe
    tb = 1
    while tb < B and tb < 8 and B % (tb * 2) == 0 \
            and (tb * 2) * per_batch_bytes <= budget:
        tb *= 2
    return tb, ts


def linear_on_channel(x, weight, bias=None):
    """x: [B, C_in, H, W] -> [B, C_out, H, W]. weight: [C_out, C_in] (torch layout)."""
    B, C_in, H, W = x.shape
    C_out = weight.shape[0]
    HW = H * W

    x3 = x.reshape(B, C_in, HW)
    if bias is None:
        bias = jnp.zeros((C_out,), jnp.float32)
    # Pack weight + bias into one contiguous f32 buffer -> a single parameter DMA.
    wb = jnp.concatenate(
        [weight.astype(jnp.float32), bias.astype(jnp.float32)[:, None]], axis=1)

    tb, ts = _pick_tiles(B, C_in, C_out, HW)
    grid = (B // tb, HW // ts)

    out = pl.pallas_call(
        _linear_on_channel_kernel,
        out_shape=jax.ShapeDtypeStruct((B, C_out, HW), x.dtype),
        grid_spec=pltpu.PrefetchScalarGridSpec(
            num_scalar_prefetch=0,
            grid=grid,
            in_specs=[
                pl.BlockSpec((tb, C_in, ts), lambda b, s: (b, 0, s)),
                # Constant index_map: packed params stay resident in VMEM.
                pl.BlockSpec((C_out, C_in + 1), lambda b, s: (0, 0)),
            ],
            out_specs=pl.BlockSpec((tb, C_out, ts), lambda b, s: (b, 0, s)),
        ),
        compiler_params=pltpu.CompilerParams(
            dimension_semantics=("parallel", "parallel")),
        cost_estimate=pl.CostEstimate(
            flops=2 * B * HW * C_in * C_out,
            transcendentals=0,
            bytes_accessed=x.dtype.itemsize * B * HW * (C_in + C_out)
                           + 4 * C_out * (C_in + 1),
        ),
    )(x3, wb)
    return out.reshape(B, C_out, H, W)


def init_params(key, in_features, out_features):
    """torch.nn.Linear-style uniform init; weight kept in torch [out, in] layout."""
    kw, kb = jax.random.split(key)
    bound = 1.0 / sqrt(in_features)
    w = jax.random.uniform(kw, (out_features, in_features), jnp.float32, -bound, bound)
    b = jax.random.uniform(kb, (out_features,), jnp.float32, -bound, bound)
    return w, b


def _reference(x, weight, bias):
    # x.permute(0,2,3,1) @ W.T + b, then permute back == NCHW einsum.
    y = jnp.einsum("bchw,oc->bohw", x.astype(jnp.float32),
                   weight.astype(jnp.float32))
    return y + bias[None, :, None, None]


if __name__ == "__main__":
    key = jax.random.PRNGKey(0)
    k_param, k_x = jax.random.split(key)

    # Small shapes consistent with the module: batch=2, C_in=4, C_out=8, 16x16 spatial.
    B, C_IN, C_OUT, H, W = 2, 4, 8, 16, 16
    weight, bias = init_params(k_param, C_IN, C_OUT)
    x = jax.random.normal(k_x, (B, C_IN, H, W), jnp.float32)

    out = linear_on_channel(x, weight, bias)
    out = jax.block_until_ready(out)

    ref = _reference(x, weight, bias)
    assert out.shape == (B, C_OUT, H, W), out.shape
    assert jnp.allclose(out, ref, atol=1e-5, rtol=1e-5), \
        float(jnp.max(jnp.abs(out - ref)))

    print("KERNEL_OK")
</pallas_src>

<mosaic_0001>
module attributes {stable_mosaic.version = 11 : i64} {
  func.func @_linear_on_channel_kernel(%arg0: i32, %arg1: i32, %arg2: memref<2x4x256xf32, #tpu.memory_space<vmem>>, %arg3: memref<8x5xf32, #tpu.memory_space<vmem>>, %arg4: memref<2x8x256xf32, #tpu.memory_space<vmem>>) attributes {dimension_semantics = [#tpu.dimension_semantics<parallel>, #tpu.dimension_semantics<parallel>], iteration_bounds = array<i64: 1, 1>, scalar_prefetch = 0 : i64, scratch_operands = 0 : i64, tpu.core_type = #tpu.core_type<tc>, window_params = [{transform_indices = @transform_0, window_bounds = array<i64: 2, 4, 256>}, {pipeline_mode = #tpu.pipeline_mode<synchronous>, transform_indices = @transform_1, window_bounds = array<i64: 8, 5>}, {transform_indices = @transform_2, window_bounds = array<i64: 2, 8, 256>}]} {
    %c0 = arith.constant 0 : index
    %c0_0 = arith.constant 0 : index
    %0 = vector.load %arg3[%c0, %c0_0] : memref<8x5xf32, #tpu.memory_space<vmem>>, vector<8x5xf32>
    %1 = vector.extract_strided_slice %0 {offsets = [0, 0], sizes = [8, 4], strides = [1, 1]} : vector<8x5xf32> to vector<8x4xf32>
    %2 = vector.extract_strided_slice %0 {offsets = [0, 4], sizes = [8, 1], strides = [1, 1]} : vector<8x5xf32> to vector<8x1xf32>
    %c0_1 = arith.constant 0 : index
    %c0_2 = arith.constant 0 : index
    %c0_3 = arith.constant 0 : index
    %3 = vector.load %arg2[%c0_1, %c0_2, %c0_3] : memref<2x4x256xf32, #tpu.memory_space<vmem>>, vector<1x4x256xf32>
    %4 = vector.shape_cast %3 : vector<1x4x256xf32> to vector<4x256xf32>
    %cst = arith.constant dense<0.000000e+00> : vector<8x256xf32>
    %5 = tpu.matmul %1, %4, %cst {dimension_numbers = #tpu.dot_dimension_numbers<[1], [0], [0], [1], [0, 0, 1, 1], [], []>} : vector<8x4xf32>, vector<4x256xf32>, vector<8x256xf32> -> vector<8x256xf32>
    %6 = vector.broadcast %2 : vector<8x1xf32> to vector<8x256xf32>
    %7 = arith.addf %5, %6 : vector<8x256xf32>
    %c0_4 = arith.constant 0 : index
    %c0_5 = arith.constant 0 : index
    %c0_6 = arith.constant 0 : index
    %8 = vector.load %arg4[%c0_4, %c0_5, %c0_6] : memref<2x8x256xf32, #tpu.memory_space<vmem>>, vector<1x8x256xf32>
    %9 = vector.shape_cast %8 : vector<1x8x256xf32> to vector<8x256xf32>
    %10 = vector.shape_cast %7 : vector<8x256xf32> to vector<1x8x256xf32>
    tpu.vector_store %arg4[%c0_4, %c0_5, %c0_6], %10 {strides = array<i32>} : memref<2x8x256xf32, #tpu.memory_space<vmem>>, vector<1x8x256xf32>,
    %c1 = arith.constant 1 : index
    %c0_7 = arith.constant 0 : index
    %c0_8 = arith.constant 0 : index
    %11 = vector.load %arg2[%c1, %c0_7, %c0_8] : memref<2x4x256xf32, #tpu.memory_space<vmem>>, vector<1x4x256xf32>
    %12 = vector.shape_cast %11 : vector<1x4x256xf32> to vector<4x256xf32>
    %cst_9 = arith.constant dense<0.000000e+00> : vector<8x256xf32>
    %13 = tpu.matmul %1, %12, %cst_9 {dimension_numbers = #tpu.dot_dimension_numbers<[1], [0], [0], [1], [0, 0, 1, 1], [], []>} : vector<8x4xf32>, vector<4x256xf32>, vector<8x256xf32> -> vector<8x256xf32>
    %14 = vector.broadcast %2 : vector<8x1xf32> to vector<8x256xf32>
    %15 = arith.addf %13, %14 : vector<8x256xf32>
    %c1_10 = arith.constant 1 : index
    %c0_11 = arith.constant 0 : index
    %c0_12 = arith.constant 0 : index
    %16 = vector.load %arg4[%c1_10, %c0_11, %c0_12] : memref<2x8x256xf32, #tpu.memory_space<vmem>>, vector<1x8x256xf32>
    %17 = vector.shape_cast %16 : vector<1x8x256xf32> to vector<8x256xf32>
    %18 = vector.shape_cast %15 : vector<8x256xf32> to vector<1x8x256xf32>
    tpu.vector_store %arg4[%c1_10, %c0_11, %c0_12], %18 {strides = array<i32>} : memref<2x8x256xf32, #tpu.memory_space<vmem>>, vector<1x8x256xf32>,
    return
  }
  func.func @transform_0(%arg0: i32, %arg1: i32) -> (i32, i32, i32) {
    %c0_i32 = arith.constant 0 : i32
    %c0_i32_0 = arith.constant 0 : i32
    return %arg0, %c0_i32, %arg1 : i32, i32, i32
  }
  func.func @transform_1(%arg0: i32, %arg1: i32) -> (i32, i32) {
    %c0_i32 = arith.constant 0 : i32
    %c0_i32_0 = arith.constant 0 : i32
    %c0_i32_1 = arith.constant 0 : i32
    return %c0_i32, %c0_i32_0 : i32, i32
  }
  func.func @transform_2(%arg0: i32, %arg1: i32) -> (i32, i32, i32) {
    %c0_i32 = arith.constant 0 : i32
    %c0_i32_0 = arith.constant 0 : i32
    return %arg0, %c0_i32, %arg1 : i32, i32, i32
  }
}

</mosaic_0001>

<bundles_post_ra>
// kernel: tpu_custom_call.1
= control target key start
LH: loop header
LB: loop body
LE: loop exit
PB: predicated region body
PF: predicated region fallthrough
CT: control target
= control target key end

     0   :  { %7 = vsyncpa [#allocation3], 0  ;;  %s303_s0 = inlined_call_operand.hbm [shape: f32[2,4,256], index: 0, kind: input, shape index: {}]   ;;  %s304_s1 = inlined_call_operand.hbm [shape: f32[8,5], index: 1, kind: input, shape index: {}]   ;;  %s305_s2 = inlined_call_operand.hbm [shape: f32[2,8,256], index: 2, kind: output, shape index: {}]  }
   0x1   :  { %8 = vsyncpa [#allocation6], 0 }
   0x2   :  { %9 = vsyncpa [#allocation4], 0  ;;  %s14_s11 = sshll.u32 %s303_s0, 4  ;;  %s271_s12 = smov [#allocation2]   ;;  %s15_s11 = int_to_ptr.hbm [resolvable:$true] %s14_s11 }
   0x3   :  { %s16_s13 = sshll.u32 %s271_s12, 4  ;;  %s28_s16 = sshll.u32 %s304_s1, 4  ;;  %s17_s13 = int_to_ptr.vmem [resolvable:$true] %s16_s13  ;;  %s29_s16 = int_to_ptr.hbm [resolvable:$true] %s28_s16 }
   0x4   :  { %s272_s17 = smov 128   ;;  %s273_s18 = smov 8  }
   0x5   :  { %22 = dma.hbm_to_vmem [thread:$0]  %s15_s11, 256, %s17_s13, [#allocation3], %s272_s17, %s272_s17, %s273_s18  }
   0x6   :  { %s274_s19 = smov [#allocation5]  }
   0x7   :  { %s30_s20 = sshll.u32 %s274_s19, 4  ;;  %s31_s20 = int_to_ptr.vmem [resolvable:$true] %s30_s20 }
   0x8   :  { %33 = dma.hbm_to_vmem [thread:$0]  %s29_s16, 128, %s31_s20, [#allocation6]  }
   0x9   :  { %265 = dma.done.wait [#allocation3], 256  }
   0xa   :  { %266 = vsyncadd [#allocation3], 4294967040 }
   0xb   :  { %267 = dma.done.wait [#allocation6], 128  }
   0xc   :  { %268 = vsyncadd [#allocation6], 4294967168  ;;  %v275_v0 = vmov 4   ;;  %v43_v1 = vld [vmem:[#allocation2] sm:$0xff]  ;;  %v42_v2 = vld [vmem:[#allocation5] sm:$0xff]  ;;  %vm56_vm0 = vcmask 1043456  }
   0xd   :  { %192 = vset.pattern.permute.xlu0 %v275_v0  ;;  %50 = vst [vmem:[#allocation1] ss:$2 sm:$0xff] %v43_v1  ;;  %v104_v3 = vld [vmem:[#allocation2 + $0x8] sm:$0xff]  ;;  %vm53_vm1 = vcmask 31744   ;;  %s276_s0 = smov [#allocation7]   ;;  %s162_s23 = sshll.u32 %s305_s2, 4  ;;  %s163_s23 = int_to_ptr.hbm [resolvable:$true] %s162_s23 }
   0xe   :  { %46 = vperm.xlu0 %192, %v42_v2   ;;  %s160_s1 = sshll.u32 %s276_s0, 4  ;;  %s277_s24 = smov 256   ;;  %s161_s1 = int_to_ptr.vmem [resolvable:$true] %s160_s1 }
   0xf   :  { %s278_s25 = smov 16  }
  0x14   :  { %v51_v4 = vld.sshfl [vmem:[#allocation1] sm:$0xff pattern:$0x75316420]  ;;  %v52_v5 = vld.sshfl [vmem:[#allocation1 + $0x8] sm:$0xff pattern:$0x75316420] }
  0x15   :  { %106 = vst [vmem:[#allocation1] ss:$2 sm:$0xff] %v104_v3  ;;  %176 = vmatpush.msk.msra.mxu0 %vm56_vm0, %v51_v4  ;;  %178 = vmatpush.msk.msra.mxu1 %vm56_vm0, %v52_v5 }
  0x16   :  { %177 = vmatmul.msk.f32.vlgmr.msra.gmra.mxu0 %vm53_vm1, %v42_v2  ;;  %179 = vmatmul.msk.f32.vlgmr.msra.gmra.mxu1 %vm53_vm1, %v42_v2 }
  0x1c   :  { %v107_v6 = vld.sshfl [vmem:[#allocation1] sm:$0xff pattern:$0x75316420]  ;;  %v108_v7 = vld.sshfl [vmem:[#allocation1 + $0x8] sm:$0xff pattern:$0x75316420] }
  0x1d   :  { %180 = vmatpush.msk.msra.mxu2 %vm56_vm0, %v107_v6  ;;  %182 = vmatpush.msk.msra.mxu3 %vm56_vm0, %v108_v7 }
  0x1e   :  { %181 = vmatmul.msk.f32.vlgmr.msra.gmra.mxu2 %vm53_vm1, %v42_v2  ;;  %183 = vmatmul.msk.f32.vlgmr.msra.gmra.mxu3 %vm53_vm1, %v42_v2 }
  0x80   :  { %v47_v8 = vpop.permute.xlu0 %46 }
  0x93   :  { %v78_v9 = vpop.f32.mrf.mxu0  ;;  %v98_v10 = vpop.f32.mrf.mxu1 }
  0x94   :  { %v79_v11 = vadd.f32 %v78_v9, %v47_v8  ;;  %v99_v12 = vadd.f32 %v98_v10, %v47_v8 }
  0x96   :  { %101 = vst [vmem:[#allocation7] sm:$0xff] %v79_v11 }
  0x97   :  { %102 = vst [vmem:[#allocation7 + $0x8] sm:$0xff] %v99_v12 }
  0xa1   :  { %v130_v13 = vpop.f32.mrf.mxu2  ;;  %v150_v14 = vpop.f32.mrf.mxu3 }
  0xa2   :  { %v131_v15 = vadd.f32 %v130_v13, %v47_v8  ;;  %v151_v16 = vadd.f32 %v150_v14, %v47_v8 }
  0xa4   :  { %154 = vst [vmem:[#allocation7 + $0x10] sm:$0xff] %v131_v15 }
  0xa5   :  { %155 = vst [vmem:[#allocation7 + $0x18] sm:$0xff] %v151_v16 }
  0xa6   :  { %168 = dma.vmem_to_hbm [thread:$0]  %s161_s1, 512, %s163_s23, [#allocation4], %s277_s24, %s277_s24, %s278_s25  }
  0xa7   :  { %269 = dma.done.wait [#allocation4], 512  }
  0xa8   :  { %270 = vsyncadd [#allocation4], 4294966784 }
  0xa9   :  { %173 = vsyncpa [#allocation3], 1 }
  0xaa   :  { %174 = vsyncpa [#allocation6], 1 }
  0xab   :  { %175 = vsyncpa [#allocation4], 1 }

</bundles_post_ra>
